<compile_context>
chip_gen: v7x
topology: tpu7x:2x2x1
jax: 0.10.0
libtpu: 0.0.40
codegen_flags: <defaults>
</compile_context>

<pallas_src>
import jax
import jax.numpy as jnp
from jax.experimental import pallas as pl
from jax.experimental.pallas import tpu as pltpu


def _scaler_kernel(x_ref, sb_ref, o_ref):
    # x_ref:  (R_TILE, T_TILE) tile of the flattened, time-padded input
    # sb_ref: (R_TILE, 2) packed per-row [scale, bias], scale = 1/std, bias = -mean/std
    scale = sb_ref[:, 0:1]
    bias = sb_ref[:, 1:2]
    o_ref[...] = (x_ref[...] * scale + bias).astype(o_ref.dtype)


def _round_up(x: int, m: int) -> int:
    return ((x + m - 1) // m) * m


def _pick_tile(full: int, target: int, align: int) -> int:
    """Largest tile <= target that is a multiple of `align`; prefers one that
    divides `full` exactly (no partial blocks -> unmasked stores)."""
    if full <= target:
        return full
    top = max(align, (target // align) * align)
    for cand in range(top, align - 1, -align):
        if full % cand == 0:
            return cand
    return top


def preprocessor_forward(x, mean, std):
    """Channel-wise standardization: (x - mean) / std.

    x:    (B, C, T) float32
    mean: (C, 1)    float32
    std:  (C, 1)    float32
    """
    B, C, T = x.shape
    out_dtype = x.dtype
    itemsize = jnp.dtype(out_dtype).itemsize
    # Sublane packing: 8 rows for 32-bit, 16 for bf16, 32 for int8/fp8.
    row_align = max(8, 32 // itemsize)

    # --- tiny per-channel precompute in the wrapper (f32) --------------------
    scale = 1.0 / std.astype(jnp.float32)            # (C, 1)
    bias = -mean.astype(jnp.float32) * scale         # (C, 1)
    sb = jnp.concatenate([scale, bias], axis=1)      # (C, 2) packed operand
    R = B * C
    sb = jnp.tile(sb, (B, 1))                        # (B*C, 2)

    # Flatten batch into the row axis; pad time to a multiple of 128 lanes.
    x2 = x.reshape(R, T)
    T_pad = _round_up(T, 128)
    if T_pad != T:
        x2 = jnp.pad(x2, ((0, 0), (0, T_pad - T)))

    # --- generation-aware tile sizing ----------------------------------------
    try:
        vmem_cap = pltpu.get_tpu_info().vmem_capacity_bytes
    except Exception:
        vmem_cap = 64 << 20  # conservative (v7x-sized) fallback
    # ~4 blocks resident (double-buffered in + out); keep them within ~1/4 VMEM.
    block_target = max(1 << 20, min(8 << 20, (vmem_cap // 4) // 4))

    t_tile = _pick_tile(T_pad, 4096, 128)
    r_target = max(row_align, block_target // (t_tile * itemsize))
    r_tile = _pick_tile(R, r_target, row_align)

    grid = (pl.cdiv(R, r_tile), pl.cdiv(T_pad, t_tile))

    # Megacore (v7x) hint: if everything fits one block but the array is large
    # enough to be worth sharding, halve the row tile so both TCs get work.
    if grid == (1, 1) and R * T_pad * itemsize >= (1 << 20) and R >= 2 * row_align:
        r_tile = _round_up(pl.cdiv(R, 2), row_align)
        grid = (pl.cdiv(R, r_tile), 1)

    block_bytes = r_tile * t_tile * itemsize
    footprint = 2 * 2 * block_bytes + 2 * (r_tile * 2 * 4)   # in/out dbl-buf + scale/bias
    vmem_limit = int(min(vmem_cap // 2, max(footprint + (2 << 20), 16 << 20)))

    grid_spec = pltpu.PrefetchScalarGridSpec(
        num_scalar_prefetch=0,
        grid=grid,
        in_specs=[
            pl.BlockSpec((r_tile, t_tile), lambda i, j: (i, j)),
            pl.BlockSpec((r_tile, 2), lambda i, j: (i, 0)),
        ],
        out_specs=pl.BlockSpec((r_tile, t_tile), lambda i, j: (i, j)),
    )

    out2 = pl.pallas_call(
        _scaler_kernel,
        out_shape=jax.ShapeDtypeStruct((R, T_pad), out_dtype),
        grid_spec=grid_spec,
        compiler_params=pltpu.CompilerParams(
            dimension_semantics=("parallel", "parallel"),
            vmem_limit_bytes=vmem_limit,
        ),
    )(x2, sb)

    if T_pad != T:
        out2 = out2[:, :T]
    return out2.reshape(B, C, T)


if __name__ == "__main__":
    key = jax.random.PRNGKey(0)
    k_x, k_m, k_s = jax.random.split(key, 3)

    # Small shapes consistent with the module: batch=2, channels=4, time=256.
    B, C, T = 2, 4, 256
    x = jax.random.normal(k_x, (B, C, T), dtype=jnp.float32)

    # Deterministic synthetic scaler parameters (ChannelWiseScaler buffers).
    mean = jax.random.normal(k_m, (C, 1), dtype=jnp.float32)
    std = jax.random.uniform(k_s, (C, 1), dtype=jnp.float32,
                             minval=0.5, maxval=2.0)

    out = preprocessor_forward(x, mean, std)
    out = jax.block_until_ready(out)

    # Reference check against plain JAX broadcast semantics.
    ref = (x - mean[None, :, :]) / std[None, :, :]
    assert out.shape == (B, C, T)
    assert jnp.allclose(out, ref, atol=1e-5, rtol=1e-5)

    print("KERNEL_OK")
</pallas_src>

<mosaic_0001>
module attributes {stable_mosaic.version = 11 : i64} {
  func.func @_scaler_kernel(%arg0: i32, %arg1: i32, %arg2: memref<8x256xf32, #tpu.memory_space<vmem>>, %arg3: memref<8x2xf32, #tpu.memory_space<vmem>>, %arg4: memref<8x256xf32, #tpu.memory_space<vmem>>) attributes {dimension_semantics = [#tpu.dimension_semantics<parallel>, #tpu.dimension_semantics<parallel>], iteration_bounds = array<i64: 1, 1>, scalar_prefetch = 0 : i64, scratch_operands = 0 : i64, tpu.core_type = #tpu.core_type<tc>, window_params = [{transform_indices = @transform_0, window_bounds = array<i64: 8, 256>}, {transform_indices = @transform_1, window_bounds = array<i64: 8, 2>}, {transform_indices = @transform_2, window_bounds = array<i64: 8, 256>}]} {
    %c0 = arith.constant 0 : index
    %c0_0 = arith.constant 0 : index
    %0 = vector.load %arg3[%c0, %c0_0] : memref<8x2xf32, #tpu.memory_space<vmem>>, vector<8x1xf32>
    %c0_1 = arith.constant 0 : index
    %c1 = arith.constant 1 : index
    %1 = vector.load %arg3[%c0_1, %c1] : memref<8x2xf32, #tpu.memory_space<vmem>>, vector<8x1xf32>
    %c0_2 = arith.constant 0 : index
    %c0_3 = arith.constant 0 : index
    %2 = vector.load %arg2[%c0_2, %c0_3] : memref<8x256xf32, #tpu.memory_space<vmem>>, vector<8x256xf32>
    %3 = vector.broadcast %0 : vector<8x1xf32> to vector<8x256xf32>
    %4 = arith.mulf %2, %3 : vector<8x256xf32>
    %5 = vector.broadcast %1 : vector<8x1xf32> to vector<8x256xf32>
    %6 = arith.addf %4, %5 : vector<8x256xf32>
    %c0_4 = arith.constant 0 : index
    %c0_5 = arith.constant 0 : index
    %7 = vector.load %arg4[%c0_4, %c0_5] : memref<8x256xf32, #tpu.memory_space<vmem>>, vector<8x256xf32>
    tpu.vector_store %arg4[%c0_4, %c0_5], %6 {strides = array<i32>} : memref<8x256xf32, #tpu.memory_space<vmem>>, vector<8x256xf32>,
    return
  }
  func.func @transform_0(%arg0: i32, %arg1: i32) -> (i32, i32) {
    %c0_i32 = arith.constant 0 : i32
    return %arg0, %arg1 : i32, i32
  }
  func.func @transform_1(%arg0: i32, %arg1: i32) -> (i32, i32) {
    %c0_i32 = arith.constant 0 : i32
    %c0_i32_0 = arith.constant 0 : i32
    return %arg0, %c0_i32 : i32, i32
  }
  func.func @transform_2(%arg0: i32, %arg1: i32) -> (i32, i32) {
    %c0_i32 = arith.constant 0 : i32
    return %arg0, %arg1 : i32, i32
  }
}

</mosaic_0001>

<bundles_post_ra>
// kernel: tpu_custom_call.1
= control target key start
LH: loop header
LB: loop body
LE: loop exit
PB: predicated region body
PF: predicated region fallthrough
CT: control target
= control target key end

     0   :  { %7 = vsyncpa [#allocation3], 0  ;;  %s157_s0 = inlined_call_operand.hbm [shape: f32[8,256], index: 0, kind: input, shape index: {}]   ;;  %s158_s1 = inlined_call_operand.vmem [shape: f32[8,2], index: 1, kind: input, shape index: {}]   ;;  %s159_s2 = inlined_call_operand.hbm [shape: f32[8,256], index: 2, kind: output, shape index: {}]  }
   0x1   :  { %8 = vsyncpa [#allocation4], 0  ;;  %s111_s9 = smov [#allocation2]   ;;  %s63_s13 = scalar_lea.hbm %s157_s0, 256 }
   0x2   :  { %s15_s10 = sshll.u32 %s111_s9, 4  ;;  %p64_p0 = scmp.ne.s32.totalorder %s157_s0, %s63_s13  ;;  %s16_s10 = int_to_ptr.vmem [resolvable:$true] %s15_s10 }
   0x3   :  { %p67_p1 = scmp.lt.u32.totalorder %s63_s13, %s157_s0 }
   0x5   :  { %p69_p2 = pnand %p67_p1, %p64_p0 }
   0x7   :  { %72 = shalt.err (!%p69_p2)
}
   0x8   :  { %s73_s18 = scalar_lea.vmem %s16_s10, 256  ;;  %p78_p4 = scmp.lt.s32.totalorder %s16_s10, %s16_s10 }
   0x9   :  { %p74_p3 = scmp.ne.s32.totalorder %s16_s10, %s73_s18  ;;  %p79_p5 = scmp.lt.s32.totalorder %s73_s18, %s73_s18 }
   0xb   :  { %p80_p6 = por %p79_p5, %p78_p4 }
   0xd   :  { %p81_p7 = pnand %p80_p6, %p74_p3 }
   0xf   :  { %84 = shalt.err (!%p81_p7)
}
  0x10   :  { %18 = dma.hbm_to_vmem [thread:$0]  %s157_s0, 256, %s16_s10, [#allocation3]  }
  0x11   :  { %107 = dma.done.wait [#allocation3], 256  }
  0x12   :  { %108 = vsyncadd [#allocation3], 4294967040  ;;  %v112_v0 = vmov 0   ;;  %v24_v1 = vld [vmem:[%s158_s1] sm:$0xff]  ;;  %v113_v2 = vmov 1   ;;  %v26_v5 = vld [vmem:[#allocation2 + $0x8] sm:$0xff] }
  0x13   :  { %61 = vset.pattern.permute.xlu0 %v112_v0  ;;  %v25_v4 = vld [vmem:[#allocation2] sm:$0xff]  ;;  %s114_s23 = smov [#allocation5]  }
  0x14   :  { %29 = vperm.xlu0 %61, %v24_v1   ;;  %s48_s24 = sshll.u32 %s114_s23, 4  ;;  %s49_s24 = int_to_ptr.vmem [resolvable:$true] %s48_s24 }
  0x15   :  { %s85_s0 = scalar_lea.vmem %s49_s24, 256  ;;  %p90_p9 = scmp.lt.s32.totalorder %s49_s24, %s49_s24 }
  0x16   :  { %p86_p8 = scmp.ne.s32.totalorder %s49_s24, %s85_s0  ;;  %p91_p10 = scmp.lt.s32.totalorder %s85_s0, %s85_s0 }
  0x18   :  { %62 = vset.pattern.permute.xlu0 %v113_v2  ;;  %p92_p11 = por %p91_p10, %p90_p9 }
  0x19   :  { %35 = vperm.xlu0 %62, %v24_v1  }
  0x1a   :  { %p93_p12 = pnand %p92_p11, %p86_p8 }
  0x93   :  { %v30_v3 = vpop.permute.xlu0 %29 }
  0x94   :  { %v32_v6 = vmul.f32 %v30_v3, %v25_v4  ;;  %v33_v7 = vmul.f32 %v30_v3, %v26_v5 }
  0x98   :  { %v36_v8 = vpop.permute.xlu0 %35 }
  0x99   :  { %v38_v9 = vadd.f32 %v36_v8, %v32_v6  ;;  %v39_v10 = vadd.f32 %v36_v8, %v33_v7 }
  0x9b   :  { %40 = vst [vmem:[#allocation5] sm:$0xff] %v38_v9  ;;  %41 = vst [vmem:[#allocation5 + $0x8] sm:$0xff] %v39_v10 }
  0x9c   :  { %96 = shalt.err (!%p93_p12)
}
  0x9d   :  { %s97_s26 = scalar_lea.hbm %s159_s2, 256 }
  0x9e   :  { %p98_p13 = scmp.ne.s32.totalorder %s159_s2, %s97_s26  ;;  %p101_p0 = scmp.lt.u32.totalorder %s97_s26, %s159_s2 }
  0xa0   :  { %p103_p1 = pnand %p101_p0, %p98_p13 }
  0xa2   :  { %106 = shalt.err (!%p103_p1)
}
  0xa3   :  { %51 = dma.vmem_to_hbm [thread:$0]  %s49_s24, 256, %s159_s2, [#allocation4]  }
  0xa4   :  { %109 = dma.done.wait [#allocation4], 256  }
  0xa5   :  { %110 = vsyncadd [#allocation4], 4294967040 }
  0xa6   :  { %55 = vsyncpa [#allocation3], 1 }
  0xa7   :  { %56 = vsyncpa [#allocation4], 1 }

</bundles_post_ra>
